<compile_context>
chip_gen: v6e
topology: v6e:2x2x1
jax: 0.10.0
libtpu: 0.0.40
codegen_flags: <defaults>
</compile_context>

<pallas_src>
import numpy as np
import jax
import jax.numpy as jnp
from jax.experimental import pallas as pl
from jax.experimental.pallas import tpu as pltpu


# ----------------------------------------------------------------------------
# Kernel A: 1x1 conv (bf16 MXU matmul over channels) + folded BN1 + ReLU
#   x block: (1, Cin, H*W)  -- lane-dense load
#   y block: (1, Cbt, H*W)  -- lane-dense store
# ----------------------------------------------------------------------------
def _conv1x1_bn_relu_kernel(x_ref, w_ref, b_ref, y_ref):
    x = x_ref[0].astype(jnp.bfloat16)                                   # (Cin, HW)
    y = jnp.dot(w_ref[...], x, preferred_element_type=jnp.float32)      # (Cbt, HW), f32 acc
    y_ref[0] = jnp.maximum(y + b_ref[...], 0.0)


def conv1x1_bn_relu(x_cm, w1s_bf16, shift1):
    N, Cin, HW = x_cm.shape
    Cbt = w1s_bf16.shape[0]
    return pl.pallas_call(
        _conv1x1_bn_relu_kernel,
        out_shape=jax.ShapeDtypeStruct((N, Cbt, HW), jnp.float32),
        grid_spec=pltpu.PrefetchScalarGridSpec(
            num_scalar_prefetch=0,
            grid=(N,),
            in_specs=[
                pl.BlockSpec((1, Cin, HW), lambda n: (n, 0, 0)),
                pl.BlockSpec((Cbt, Cin), lambda n: (0, 0)),
                pl.BlockSpec((Cbt, 1), lambda n: (0, 0)),
            ],
            out_specs=pl.BlockSpec((1, Cbt, HW), lambda n: (n, 0, 0)),
        ),
        compiler_params=pltpu.CompilerParams(dimension_semantics=("parallel",)),
    )(x_cm, w1s_bf16, shift1)


# ----------------------------------------------------------------------------
# Kernel B: BoxConv2d (+folded BN2 scale) + 3x3 conv with zero padding
#           (+folded BN2 shift & conv bias), all as structured matmuls.
#   y block:   (1, Cbt*H, W)      spatial form (free host reshape of kernel A output)
#   out block: (1, Cout, H*W)     lane-dense output layout
# ----------------------------------------------------------------------------
def make_box_conv3x3_kernel(Cbt, K, Cout, H, W):
    CK = Cbt * K

    def kernel(y_ref, rm_ref, cmw_ref, gcat_ref, shs_ref, sel_ref, bias_ref, o_ref):
        y = y_ref[0]                                                    # (Cbt*H, W)

        # ---- BoxConv2d + folded BN2 scale ---------------------------------
        # z_ck = Rm[ck] @ y_c @ Cm[ck]; the column operator already places the result
        # into the ck-th W-wide block of zcat, so zcat is built purely by MXU
        # accumulation (no concatenate / reshape / roll / misaligned slices).
        zcat = jnp.zeros((H, CK * W), jnp.float32)
        for c in range(Cbt):
            y_c = y[c * H:(c + 1) * H, :]                               # sublane-aligned slice
            for k in range(K):
                ck = c * K + k
                t = jnp.dot(rm_ref[ck], y_c, preferred_element_type=jnp.float32)        # (H, W)
                zcat = zcat + jnp.dot(t, cmw_ref[ck], preferred_element_type=jnp.float32)

        # ---- 3x3 conv (zero padding) as structured matmuls ----------------
        # gcat[i, o] folds the three dx taps and the CK->1 channel mixing of kernel row i;
        # shs[i, o] folds the dy row shift and the placement into the o-th row block.
        out_stack = jnp.zeros((Cout * H, W), jnp.float32)
        for i in range(3):
            for o in range(Cout):
                inner = jnp.dot(zcat, gcat_ref[i, o], preferred_element_type=jnp.float32)  # (H, W)
                out_stack = out_stack + jnp.dot(
                    shs_ref[i, o], inner, preferred_element_type=jnp.float32)

        # ---- store ---------------------------------------------------------
        # Output block is (1, Cout, H*W): HBM layout / out_spec is lane-dense.  Rows are
        # gathered with one tiny selection matmul per image row; the precomputed bias
        # field carries the conv bias and the BN2 shift (exact at zero-padded borders).
        for h in range(H):
            strip = jnp.dot(sel_ref[h], out_stack, preferred_element_type=jnp.float32)     # (Cout, W)
            o_ref[0, :, h * W:(h + 1) * W] = strip + bias_ref[h]

    return kernel


def box_bn_conv3x3(y_s, consts):
    d = consts["dims"]
    Cbt, K, CK, Cout, H, W = d["Cbt"], d["K"], d["CK"], d["Cout"], d["H"], d["W"]
    N = y_s.shape[0]
    kernel = make_box_conv3x3_kernel(Cbt, K, Cout, H, W)
    return pl.pallas_call(
        kernel,
        out_shape=jax.ShapeDtypeStruct((N, Cout, H * W), jnp.float32),
        grid_spec=pltpu.PrefetchScalarGridSpec(
            num_scalar_prefetch=0,
            grid=(N,),
            in_specs=[
                pl.BlockSpec((1, Cbt * H, W), lambda n: (n, 0, 0)),
                pl.BlockSpec((CK, H, H), lambda n: (0, 0, 0)),
                pl.BlockSpec((CK, W, CK * W), lambda n: (0, 0, 0)),
                pl.BlockSpec((3, Cout, CK * W, W), lambda n: (0, 0, 0, 0)),
                pl.BlockSpec((3, Cout, Cout * H, H), lambda n: (0, 0, 0, 0)),
                pl.BlockSpec((H, Cout, Cout * H), lambda n: (0, 0, 0)),
                pl.BlockSpec((H, Cout, W), lambda n: (0, 0, 0)),
            ],
            out_specs=pl.BlockSpec((1, Cout, H * W), lambda n: (n, 0, 0)),
        ),
        compiler_params=pltpu.CompilerParams(dimension_semantics=("parallel",)),
    )(y_s, consts["rm"], consts["cmw"], consts["gcat"], consts["shs"],
      consts["sel"], consts["bias"])


# ----------------------------------------------------------------------------
# Full OutConv forward: only free reshapes between the two pallas_calls.
# ----------------------------------------------------------------------------
def out_conv_forward(x, consts):
    d = consts["dims"]
    N = x.shape[0]
    H, W, Cin, Cbt, Cout = d["H"], d["W"], d["Cin"], d["Cbt"], d["Cout"]
    x_cm = x.reshape(N, Cin, H * W)                                    # free reshape
    y = conv1x1_bn_relu(x_cm, consts["w1s"], consts["shift1"])         # (N, Cbt, H*W)
    y_s = y.reshape(N, Cbt * H, W)                                     # free reshape
    out = box_bn_conv3x3(y_s, consts)                                  # (N, Cout, H*W)
    return out.reshape(N, Cout, H, W)                                  # free reshape -> NCHW


# ----------------------------------------------------------------------------
# Host-side constant folding (numpy): BN folding + structured operator matrices.
# ----------------------------------------------------------------------------
def build_outconv_constants(w1, bn1_scale, bn1_shift, box_raw,
                            bn2_scale, bn2_shift, w3, b3, H, W):
    w1 = np.asarray(w1, np.float32)
    w3 = np.asarray(w3, np.float32)
    b3 = np.asarray(b3, np.float32)
    Cin, Cbt = w1.shape
    K = len(box_raw[0])
    CK = Cbt * K
    Cout = w3.shape[-1]
    assert CK == w3.shape[2]

    # Stage 1: fold BN1 scale into the (transposed) 1x1 weights.
    w1s = (w1.T * bn1_scale[:, None]).astype(np.float32)               # (Cbt, Cin)
    shift1 = bn1_shift.reshape(Cbt, 1).astype(np.float32)

    # Stage 2: box filter as separable row/column operators; BN2 scale and the
    # nominal 1/area normalization folded into the row operator.  The column
    # operator also places its output into the ck-th block of the wide zcat.
    rm = np.zeros((CK, H, H), np.float32)
    cmw = np.zeros((CK, W, CK * W), np.float32)
    for c in range(Cbt):
        for k in range(K):
            ck = c * K + k
            ymin, yhi, xmin, xhi = box_raw[c][k]
            coef = float(bn2_scale[ck]) / float((yhi - ymin) * (xhi - xmin))
            for h in range(H):
                r0, r1 = max(0, h + ymin), min(H, h + yhi)
                if r1 > r0:
                    rm[ck, h, r0:r1] = coef
            for w in range(W):
                s0, s1 = max(0, w + xmin), min(W, w + xhi)
                if s1 > s0:
                    cmw[ck, s0:s1, ck * W + w] = 1.0

    # Stage 3: 3x3 conv taps as shift matrices (zero outside the image).
    swt = np.zeros((3, W, W), np.float32)          # (A @ swt[j])[:, w] = A[:, w+j-1]
    for j in range(3):
        for w in range(W):
            s = w + j - 1
            if 0 <= s < W:
                swt[j, s, w] = 1.0
    gcat = np.zeros((3, Cout, CK * W, W), np.float32)
    for i in range(3):
        for o in range(Cout):
            for c in range(CK):
                g = np.zeros((W, W), np.float32)
                for j in range(3):
                    g += w3[i, j, c, o] * swt[j]
                gcat[i, o, c * W:(c + 1) * W, :] = g
    # shs[i, o]: row-shift by (i-1) with zero fill, placed into rows [o*H, (o+1)*H).
    shs = np.zeros((3, Cout, Cout * H, H), np.float32)
    for i in range(3):
        for o in range(Cout):
            for h in range(H):
                r = h + i - 1
                if 0 <= r < H:
                    shs[i, o, o * H + h, r] = 1.0
    # sel[h]: gathers row h of every output channel from out_stack.
    sel = np.zeros((H, Cout, Cout * H), np.float32)
    for h in range(H):
        for o in range(Cout):
            sel[h, o, o * H + h] = 1.0

    # Bias field = conv bias + BN2 shift pushed through the zero-padded 3x3 conv (border-exact).
    bias_field = np.zeros((Cout, H, W), np.float32)
    for h in range(H):
        vi = [i for i in range(3) if 0 <= h + i - 1 < H]
        for w in range(W):
            vj = [j for j in range(3) if 0 <= w + j - 1 < W]
            wsum = w3[np.ix_(vi, vj)].sum(axis=(0, 1))                 # (CK, Cout)
            bias_field[:, h, w] = b3 + (bn2_shift[:, None] * wsum).sum(axis=0)
    bias_hcw = np.transpose(bias_field, (1, 0, 2))                     # (H, Cout, W)

    return dict(
        w1s=jnp.asarray(w1s, jnp.bfloat16),
        shift1=jnp.asarray(shift1),
        rm=jnp.asarray(rm), cmw=jnp.asarray(cmw),
        gcat=jnp.asarray(gcat), shs=jnp.asarray(shs), sel=jnp.asarray(sel),
        bias=jnp.asarray(bias_hcw),
        dims=dict(Cin=Cin, Cbt=Cbt, K=K, CK=CK, Cout=Cout, H=H, W=W),
    )


# ----------------------------------------------------------------------------
# Pure-JAX reference (module semantics, f32 HIGHEST precision).
# ----------------------------------------------------------------------------
def reference(x, raw):
    N, Cin, H, W = x.shape
    M = raw["max_box"]
    y = jnp.einsum("nchw,cd->ndhw", x, raw["w1"], precision=jax.lax.Precision.HIGHEST)
    y = y * raw["bn1_scale"][None, :, None, None] + raw["bn1_shift"][None, :, None, None]
    y = jnp.maximum(y, 0.0)

    Cbt = y.shape[1]
    P = M + 1
    ypad = jnp.pad(y, ((0, 0), (0, 0), (P, P), (P, P)))
    outs = []
    for c in range(Cbt):
        for k in range(len(raw["box_raw"][c])):
            ymin, yhi, xmin, xhi = raw["box_raw"][c][k]
            s = jnp.zeros((N, H, W), jnp.float32)
            for dy in range(ymin, yhi):
                for dx in range(xmin, xhi):
                    s = s + ypad[:, c, P + dy:P + dy + H, P + dx:P + dx + W]
            outs.append(s / float((yhi - ymin) * (xhi - xmin)))
    z = jnp.stack(outs, axis=1)
    z = z * raw["bn2_scale"][None, :, None, None] + raw["bn2_shift"][None, :, None, None]

    w_oihw = jnp.transpose(raw["w3"], (3, 2, 0, 1))
    out = jax.lax.conv_general_dilated(z, w_oihw, (1, 1), "SAME",
                                       dimension_numbers=("NCHW", "OIHW", "NCHW"),
                                       precision=jax.lax.Precision.HIGHEST)
    return out + raw["b3"][None, :, None, None]


if __name__ == "__main__":
    N, Cin, H, W = 2, 8, 16, 16
    n_boxes, Cout, M = 4, 3, 4
    Cbt = Cin // n_boxes
    CK = Cbt * n_boxes            # == Cin
    assert Cin % n_boxes == 0
    assert (H * W) % 128 == 0     # flattened spatial dim is lane-dense

    key = jax.random.PRNGKey(0)
    k1, k2, k3 = jax.random.split(key, 3)
    x = jax.random.normal(k1, (N, Cin, H, W), jnp.float32)
    w1 = jax.random.normal(k2, (Cin, Cbt), jnp.float32) * 0.3
    w3 = jax.random.normal(k3, (3, 3, Cin, Cout), jnp.float32) * 0.1
    b3 = jnp.linspace(-0.1, 0.1, Cout).astype(jnp.float32)

    # eval-mode BatchNorm folded to per-channel scale/shift (deterministic synthetic stats)
    def folded_bn(c, seed):
        rng = np.random.default_rng(seed)
        gamma = rng.uniform(0.8, 1.2, c)
        beta = rng.uniform(-0.1, 0.1, c)
        mean = rng.uniform(-0.2, 0.2, c)
        var = rng.uniform(0.5, 1.5, c)
        scale = (gamma / np.sqrt(var + 1e-5)).astype(np.float32)
        shift = (beta - mean * scale).astype(np.float32)
        return scale, shift

    bn1_scale, bn1_shift = folded_bn(Cbt, 1)
    bn2_scale, bn2_shift = folded_bn(CK, 2)

    # deterministic integer box parameters (BoxConv2d boxes, integer-rounded edges)
    rng = np.random.default_rng(3)
    box_raw = []
    for c in range(Cbt):
        rows = []
        for k in range(n_boxes):
            ymin = -int(rng.integers(0, M + 1)); ymax = int(rng.integers(0, M + 1))
            xmin = -int(rng.integers(0, M + 1)); xmax = int(rng.integers(0, M + 1))
            rows.append((ymin, ymax + 1, xmin, xmax + 1))      # (ymin, yhi, xmin, xhi)
        box_raw.append(rows)

    consts = build_outconv_constants(w1, bn1_scale, bn1_shift, box_raw,
                                     bn2_scale, bn2_shift, w3, b3, H, W)

    out = jax.block_until_ready(out_conv_forward(x, consts))

    raw = dict(w1=w1, w3=w3, b3=b3, bn1_scale=bn1_scale, bn1_shift=bn1_shift,
               bn2_scale=bn2_scale, bn2_shift=bn2_shift, box_raw=box_raw, max_box=M)
    ref = jax.block_until_ready(reference(x, raw))

    err = float(jnp.max(jnp.abs(out - ref)))
    scale = max(1.0, float(jnp.max(jnp.abs(ref))))
    assert out.shape == (N, Cout, H, W), out.shape
    # bf16 MXU inputs (f32 accumulation) on the 1x1 stage -> slightly looser tolerance than pure f32.
    assert err < 2e-2 * scale, f"mismatch: max abs err {err} (scale {scale})"

    print("KERNEL_OK")
</pallas_src>

<mosaic_0001>
module attributes {stable_mosaic.version = 11 : i64} {
  func.func @_conv1x1_bn_relu_kernel(%arg0: i32, %arg1: memref<1x8x256xf32, #tpu.memory_space<vmem>>, %arg2: memref<2x8xbf16, #tpu.memory_space<vmem>>, %arg3: memref<2x1xf32, #tpu.memory_space<vmem>>, %arg4: memref<1x2x256xf32, #tpu.memory_space<vmem>>) attributes {dimension_semantics = [#tpu.dimension_semantics<parallel>], iteration_bounds = array<i64: 2>, scalar_prefetch = 0 : i64, scratch_operands = 0 : i64, tpu.core_type = #tpu.core_type<tc>, window_params = [{transform_indices = @transform_0, window_bounds = array<i64: 1, 8, 256>}, {pipeline_mode = #tpu.pipeline_mode<synchronous>, transform_indices = @transform_1, window_bounds = array<i64: 2, 8>}, {pipeline_mode = #tpu.pipeline_mode<synchronous>, transform_indices = @transform_2, window_bounds = array<i64: 2, 1>}, {transform_indices = @transform_3, window_bounds = array<i64: 1, 2, 256>}]} {
    %c0 = arith.constant 0 : index
    %c0_0 = arith.constant 0 : index
    %c0_1 = arith.constant 0 : index
    %0 = vector.load %arg1[%c0, %c0_0, %c0_1] : memref<1x8x256xf32, #tpu.memory_space<vmem>>, vector<1x8x256xf32>
    %1 = vector.shape_cast %0 : vector<1x8x256xf32> to vector<8x256xf32>
    %2 = arith.truncf %1 : vector<8x256xf32> to vector<8x256xbf16>
    %c0_2 = arith.constant 0 : index
    %c0_3 = arith.constant 0 : index
    %3 = vector.load %arg2[%c0_2, %c0_3] : memref<2x8xbf16, #tpu.memory_space<vmem>>, vector<2x8xbf16>
    %cst = arith.constant dense<0.000000e+00> : vector<2x256xf32>
    %4 = tpu.matmul %3, %2, %cst {dimension_numbers = #tpu.dot_dimension_numbers<[1], [0], [0], [1], [0, 0, 1, 1], [], []>} : vector<2x8xbf16>, vector<8x256xbf16>, vector<2x256xf32> -> vector<2x256xf32>
    %c0_4 = arith.constant 0 : index
    %c0_5 = arith.constant 0 : index
    %5 = vector.load %arg3[%c0_4, %c0_5] : memref<2x1xf32, #tpu.memory_space<vmem>>, vector<2x1xf32>
    %6 = vector.broadcast %5 : vector<2x1xf32> to vector<2x256xf32>
    %7 = arith.addf %4, %6 : vector<2x256xf32>
    %cst_6 = arith.constant 0.000000e+00 : f32
    %8 = vector.broadcast %cst_6 : f32 to vector<2x256xf32>
    %9 = arith.maximumf %7, %8 : vector<2x256xf32>
    %c0_7 = arith.constant 0 : index
    %c0_8 = arith.constant 0 : index
    %c0_9 = arith.constant 0 : index
    %10 = vector.load %arg4[%c0_7, %c0_8, %c0_9] : memref<1x2x256xf32, #tpu.memory_space<vmem>>, vector<1x2x256xf32>
    %11 = vector.shape_cast %10 : vector<1x2x256xf32> to vector<2x256xf32>
    %12 = vector.shape_cast %9 : vector<2x256xf32> to vector<1x2x256xf32>
    tpu.vector_store %arg4[%c0_7, %c0_8, %c0_9], %12 {strides = array<i32>} : memref<1x2x256xf32, #tpu.memory_space<vmem>>, vector<1x2x256xf32>,
    return
  }
  func.func @transform_0(%arg0: i32) -> (i32, i32, i32) {
    %c0_i32 = arith.constant 0 : i32
    %c0_i32_0 = arith.constant 0 : i32
    %c0_i32_1 = arith.constant 0 : i32
    return %arg0, %c0_i32, %c0_i32_0 : i32, i32, i32
  }
  func.func @transform_1(%arg0: i32) -> (i32, i32) {
    %c0_i32 = arith.constant 0 : i32
    %c0_i32_0 = arith.constant 0 : i32
    %c0_i32_1 = arith.constant 0 : i32
    return %c0_i32, %c0_i32_0 : i32, i32
  }
  func.func @transform_2(%arg0: i32) -> (i32, i32) {
    %c0_i32 = arith.constant 0 : i32
    %c0_i32_0 = arith.constant 0 : i32
    %c0_i32_1 = arith.constant 0 : i32
    return %c0_i32, %c0_i32_0 : i32, i32
  }
  func.func @transform_3(%arg0: i32) -> (i32, i32, i32) {
    %c0_i32 = arith.constant 0 : i32
    %c0_i32_0 = arith.constant 0 : i32
    %c0_i32_1 = arith.constant 0 : i32
    return %arg0, %c0_i32, %c0_i32_0 : i32, i32, i32
  }
}

</mosaic_0001>

<bundles_post_ra>
// kernel: tpu_custom_call.1
= control target key start
LH: loop header
LB: loop body
LE: loop exit
PB: predicated region body
PF: predicated region fallthrough
CT: control target
= control target key end

     0   :  { %8 = vsyncpa [#allocation3], 0  ;;  %s682_s0 = inlined_call_operand.hbm [shape: f32[2,8,256], index: 0, kind: input, shape index: {}]   ;;  %s683_s1 = inlined_call_operand.vmem [shape: bf16[2,8], index: 1, kind: input, shape index: {}]   ;;  %s684_s2 = inlined_call_operand.vmem [shape: f32[2,1], index: 2, kind: input, shape index: {}]   ;;  %s685_s3 = inlined_call_operand.hbm [shape: f32[2,2,256], index: 3, kind: output, shape index: {}]  }
   0x1   :  { %10 = vsyncpa [#allocation3 + $0x1], 0 }
   0x2   :  { %11 = vsyncpa [#allocation4], 0 }
   0x3   :  { %13 = vsyncpa [#allocation4 + $0x1], 0  ;;  %s534_s12 = smov 0   ;;  %s536_s13 = smov 0  }
   0x4   :  { %s538_s14 = smov 0   ;;  %s540_s15 = smov 0  }
   0x5 LB: > { %s555_s16 = sadd.s32 4294967295, %s509_s15   ;;  %s350_s17 = sadd.s32 4294967294, %s509_s15   ;;  %s509_s15 = sphi %s540_s15, %s702_s15   ;;  %s505_s14 = sphi %s538_s14, %s701_s14   ;;  %s501_s13 = sphi %s536_s13, %s700_s13   ;;  %s497_s12 = sphi %s534_s12, %s699_s12  }
   0x6   : > { %s559_s18 = sadd.s32 1, %s509_s15   ;;  %s26_s19 = sadd.s32 1, %s505_s14 }
   0x7   : > { %s23_s20 = ssub.s32 %s509_s15, %s559_s18  ;;  %p33_p0 = scmp.ne.s32.totalorder %s505_s14, %s501_s13 }
   0x8   : > { %p24_p1 = scmp.eq.s32.totalorder %s23_s20, 0  ;;  %p34_p2 = scmp.eq.s32.totalorder %s509_s15, 0 }
   0x9   : > { %p39_p3 = scmp.ne.s32.totalorder %s501_s13, %s497_s12  ;;  %p40_p4 = scmp.eq.s32.totalorder %s555_s16, 0 }
   0xa   : > { %s571_s21 = scalar_select %p24_p1, %s505_s14, %s26_s19  }
   0xb   : > { %p573_p5 = por %p34_p2, %p33_p0  ;;  %p577_p6 = por %p40_p4, %p39_p3 }
   0xc   : > { %p105_p7 = scmp.eq.s32.totalorder %s555_s16, 1  ;;  %p111_p8 = scmp.eq.s32.totalorder %s350_s17, 1 }
   0xd   : > { %s689_s23 = scalar_select %p577_p6, 1, 0 }
   0xe   : > { %p381_p10 = scmp.lt.s32.totalorder %s509_s15, 2  ;;  %p584_p11 = por %p105_p7, %p33_p0 }
   0xf   : > { %p588_p12 = por %p111_p8, %p39_p3  ;;  %s137_s26 = sand.u32 1, %s505_s14  }
  0x10   : > { %s690_s24 = scalar_select %p584_p11, 1, 0 }
  0x11   : > { %s691_s25 = scalar_select %p588_p12, 1, 0 }
  0x12   : > { %s367_s27 = sshll.u32 %s509_s15, 8  ;;  %s353_s28 = sshll.u32 %s137_s26, 4 }
  0x13   : > { %s597_s4 = scalar_lea.hbm %s682_s0, %s367_s27  ;;  %s141_s5 = scalar_lea.vmem [#allocation2], %s353_s28 }
  0x14   : > { %s149_s6 = sshll.u32 %s141_s5, 4  ;;  %p601_p13 = pnand %p381_p10, %p573_p5  ;;  %s605_s6 = int_to_ptr.vmem [resolvable:$true] %s149_s6 }
  0x15   : > { %s138_s8 = scalar_lea.sflag [#allocation3], %s137_s26  ;;  %s417_s9 = scalar_lea.hbm %s597_s4, 256 }
  0x16   : > { %p418_p2 = scmp.ne.s32.totalorder %s597_s4, %s417_s9  ;;  %p419_p3 = pneg %p601_p13 }
  0x17   : > { %s422_s17 = scalar_lea.hbm %s682_s0, 512  ;;  %p423_p5 = scmp.lt.s32.totalorder %s597_s4, %s682_s0 }
  0x18   : > { %p420_p4 = pnand %p419_p3, %p418_p2  ;;  %p424_p8 = scmp.lt.s32.totalorder %s422_s17, %s417_s9 }
  0x1a   : > { %p421_p7 = pneg %p420_p4  ;;  %p425_p10 = por %p424_p8, %p423_p5 }
  0x1c   : > { %p426_p9 = pnand %p425_p10, %p421_p7 }
  0x1e   : > { %429 = shalt.err (!%p426_p9)
}
  0x1f   : > { %s430_s22 = scalar_lea.vmem %s605_s6, 256  ;;  %s511_s26 = smov [#allocation2]  }
  0x20   : > { %p431_p0 = scmp.ne.s32.totalorder %s605_s6, %s430_s22  ;;  %s435_s27 = sshll.u32 %s511_s26, 4  ;;  %s436_s27 = int_to_ptr.vmem [resolvable:$false] %s435_s27 }
  0x21   : > { %s437_s28 = scalar_lea.vmem %s436_s27, 512  ;;  %p438_p4 = scmp.lt.s32.totalorder %s605_s6, %s436_s27 }
  0x22   : > { %p433_p1 = pnand %p431_p0, %p419_p3  ;;  %p439_p12 = scmp.lt.s32.totalorder %s437_s28, %s430_s22 }
  0x24   : > { %p434_p2 = pneg %p433_p1  ;;  %p440_p11 = por %p439_p12, %p438_p4 }
  0x26   : > { %p441_p6 = pnand %p440_p11, %p434_p2 }
  0x28   : > { %444 = shalt.err (!%p441_p6)
}
  0x29   : > { %376 = dma.hbm_to_vmem [thread:$0]  (!%p601_p13), %s597_s4, 256, %s605_s6, %s138_s8  }
  0x2a   : > { %p693_p9 = scmp.lt.s32.totalorder %s509_s15, 3  ;;  %p694_p7 = scmp.ge.s32.totalorder %s509_s15, 1 }
  0x2c   : > { %p155_p0 = pnand %p694_p7, %p693_p9 }
  0x2d   : > { %s632_s29 = sand.u32 (!%p155_p0), 1, %s501_s13   ;;  %p695_p6 = scmp.ne.s32.totalorder (!%p155_p0), %s689_s23, 0 }
  0x2e   : > { %158 = sbr.rel (%p155_p0) target bundleno = 273 (0x111), region = 32  ;;  %s357_s30 = sshll.u32 (!%p155_p0), %s632_s29, 4 }
  0x2f   : > { %s161_s5 = scalar_lea.sflag (!%p155_p0), [#allocation3], %s632_s29  ;;  %s164_s9 = scalar_lea.vmem (!%p155_p0), [#allocation2], %s357_s30 }
  0x33   : > { %488 = dma.done.wait (%p695_p6), %s161_s5, 256  }
  0x34   : > { %490 = vsyncadd (%p695_p6), %s161_s5, 4294967040  ;;  %v512_v0 = vmov 0   ;;  %v189_v1 = vld [vmem:[%s164_s9 + $0x8] sm:$0xff]  ;;  %vm203_vm0 = vcmask 1043456   ;;  %v188_v2 = vld [vmem:[%s164_s9] sm:$0xff]  ;;  %vm199_vm1 = vcmask 64512  }
  0x35   : > { %242 = vmatprep.mubr.bf16.mxu0 %v512_v0  ;;  %416 = vset.pattern.permute.xlu0 %v512_v0  ;;  %v191_v3 = vpack.c.bf16 %v189_v1, %v189_v1  ;;  %v190_v4 = vpack.c.bf16 %v188_v2, %v188_v2  ;;  %v193_v5 = vld [vmem:[%s684_s2] sm:$0x3]  ;;  %s358_s8 = sshll.u32 %s632_s29, 2  ;;  %s368_s10 = sshll.u32 %s555_s16, 6 }
  0x36   : > { %196 = vperm.xlu0 %416, %v193_v5   ;;  %v192_v7 = vld [vmem:[%s683_s1] sm:$0x1]  ;;  %s186_s11 = scalar_lea.vmem [#allocation5], %s358_s8  ;;  %s278_s22 = scalar_lea.hbm %s685_s3, %s368_s10 }
  0x37   : > { %359 = vmatprep.subr.msk.bf16.mxu0 %vm203_vm0, %v191_v3  ;;  %v205_v6 = vsel %vm203_vm0, %v190_v4, 0  ;;  %s280_s17 = sshll.u32 %s186_s11, 4  ;;  %s266_s26 = scalar_lea.sflag [#allocation4], %s632_s29  ;;  %s281_s17 = int_to_ptr.vmem [resolvable:$true] %s280_s17 }
  0x38   : > { %225 = vmatpush1.bf16.msra.mxu0 %v205_v6  ;;  %s445_s27 = scalar_lea.vmem %s281_s17, 64  ;;  %p696_p12 = scmp.ne.s32.totalorder %s690_s24, 0 }
  0x39   : > { %p446_p11 = scmp.ne.s32.totalorder %s281_s17, %s445_s27  ;;  %s513_s28 = smov [#allocation5]  }
  0x3a   : > { %s449_s16 = sshll.u32 %s513_s28, 4  ;;  %s450_s16 = int_to_ptr.vmem [resolvable:$false] %s449_s16 }
  0x3b   : > { %360 = vmatmul.mubr.msk.bf16.vlgmr.msra.gmra.mxu0 %vm199_vm1, %v192_v7  ;;  %p447_p13 = pnand %p446_p11, %p696_p12  ;;  %s451_s30 = scalar_lea.vmem %s450_s16, 128 }
  0x3c   : > { %p452_p3 = scmp.lt.s32.totalorder %s281_s17, %s450_s16  ;;  %p453_p5 = scmp.lt.s32.totalorder %s451_s30, %s445_s27 }
  0x3d   : > { %p448_p1 = pneg %p447_p13 }
  0x3e   : > { %p454_p8 = por %p453_p5, %p452_p3 }
  0x40   : > { %p455_p10 = pnand %p454_p8, %p448_p1 }
  0xb1   : > { %v197_v8 = vpop.permute.xlu0 %196 }
  0xfb   : > { %v244_v9 = vpop.f32.mrf.mxu0 }
  0xfc   : > { %v245_v10 = vadd.f32 %v244_v9, %v197_v8 }
  0xfd   : > { %v246_v11 = vpop.f32.mrf.mxu0 }
  0xfe   : > { %v247_v12 = vadd.f32 %v246_v11, %v197_v8  ;;  %v251_v14 = vmax.f32 %v245_v10, 0.0 }
  0xff   : > { %v248_v13 = vpop.f32.mrf.mxu0 }
 0x100   : > { %v252_v15 = vmax.f32 %v247_v12, 0.0 }
 0x101   : > { %v249_v16 = vpop.f32.mrf.mxu0 }
 0x102   : > { %v255_v17 = vcombine.low %v251_v14, %v252_v15 }
 0x104   : > { %361 = vst.sshfl [vmem:[%s186_s11] sm:$0x33 pattern:$0x76325410] %v255_v17 }
 0x105   : > { %458 = shalt.err (!%p455_p10)
}
 0x106   : > { %s459_s5 = scalar_lea.hbm %s278_s22, 64  ;;  %s463_s4 = scalar_lea.hbm %s685_s3, 128 }
 0x107   : > { %p460_p2 = scmp.ne.s32.totalorder %s278_s22, %s459_s5  ;;  %p464_p7 = scmp.lt.s32.totalorder %s278_s22, %s685_s3 }
 0x108   : > { %p465_p0 = scmp.lt.s32.totalorder %s463_s4, %s459_s5 }
 0x109   : > { %p461_p4 = pnand %p460_p2, %p696_p12 }
 0x10a   : > { %p466_p6 = por %p465_p0, %p464_p7 }
 0x10b   : > { %p462_p9 = pneg %p461_p4 }
 0x10d   : > { %p467_p11 = pnand %p466_p6, %p462_p9 }
 0x10f   : > { %470 = shalt.err (!%p467_p11)
}
 0x110   : > { %371 = dma.vmem_to_hbm [thread:$0]  (%p696_p12), %s281_s17, 64, %s278_s22, %s266_s26  }
 0x111 PF: > { %s292_s7 = sand.u32 1, %s497_s12   ;;  %p697_p13 = scmp.ne.s32.totalorder %s691_s25, 0 }
 0x112   : > { %p698_p1 = scmp.ge.s32.totalorder %s509_s15, 2  ;;  %s293_s8 = scalar_lea.sflag [#allocation4], %s292_s7 }
 0x114   : > { %p378_p3 = pnand %p698_p1, %p697_p13 }
 0x116   : > { %p379_p5 = pneg %p378_p3 }
 0x118   : > { %492 = dma.done.wait (%p379_p5), %s293_s8, 64  }
 0x119   : > { %494 = vsyncadd (%p379_p5), %s293_s8, 4294967232  ;;  %p16_p8 = scmp.ge.s32.totalorder %s559_s18, 4   ;;  %s699_s12 = smov %s501_s13 }
 0x11a   : > { %s700_s13 = smov %s505_s14  ;;  %s701_s14 = smov %s571_s21 }
 0x11b   : > { %s702_s15 = smov %s559_s18  ;;  %18 = sbr.rel (!%p16_p8) target bundleno = 5 (0x5), region = 77 }
 0x120   :  { %298 = vsyncpa [#allocation3], 1 }
 0x121   :  { %300 = vsyncpa [#allocation3 + $0x1], 1 }
 0x122   :  { %301 = vsyncpa [#allocation4], 1 }
 0x123   :  { %303 = vsyncpa [#allocation4 + $0x1], 1 }

</bundles_post_ra>
